<compile_context>
chip_gen: v5e
topology: v5e:2x2
jax: 0.10.0
libtpu: 0.0.40
codegen_flags: <defaults>
</compile_context>

<pallas_src>
import jax
import jax.numpy as jnp
from jax import lax
from jax.experimental import pallas as pl
from jax.experimental.pallas import tpu as pltpu


_VMEM_BUDGET_BYTES = 32 * 1024 * 1024      # buffer budget (safe on v5e/v6e/v7x)
_VMEM_LIMIT_BYTES = 48 * 1024 * 1024       # scoped VMEM limit requested from Mosaic
_FAST_PATH_TABLE_BYTES = 8 * 1024 * 1024   # table <= this -> VMEM-resident path
_MAX_TOKENS_PER_CALL = 32768               # keeps scalar-prefetched ids in SMEM


def _round_up(x: int, m: int) -> int:
    return ((x + m - 1) // m) * m


def _cdiv(a: int, b: int) -> int:
    return (a + b - 1) // b


# ----------------------------------------------------------------------------
# Kernel bodies
# ----------------------------------------------------------------------------

def _embed_vmem_kernel(ids_ref, table_ref, out_ref):
    # ids_ref:   (T_pad,) int32, SMEM (scalar prefetch, pre-clamped)
    # table_ref: (V, D)   whole table, VMEM-resident (constant block index)
    # out_ref:   (tb, D)  VMEM output block
    i = pl.program_id(0)
    tb = out_ref.shape[0]
    base = i * tb                                   # hoisted out of the loop

    def body(t, carry):
        tok = ids_ref[base + t]
        out_ref[pl.ds(t, 1), :] = table_ref[pl.ds(tok, 1), :]
        return carry

    lax.fori_loop(0, tb, body, 0, unroll=8)


def _embed_dma_kernel(ids_ref, table_ref, out_ref, copy_sem):
    # ids_ref:   (T_pad,) int32, SMEM (scalar prefetch, pre-clamped)
    # table_ref: (V, D)   HBM ref (memory_space=pl.ANY) -- never loaded whole
    # out_ref:   (tb, D)  VMEM output block
    # copy_sem:  one DMA semaphore shared by all row copies of this block
    i = pl.program_id(0)
    tb = out_ref.shape[0]
    base = i * tb                                   # hoisted out of the loop

    def issue(t, carry):
        tok = ids_ref[base + t]
        pltpu.make_async_copy(
            table_ref.at[pl.ds(tok, 1), :],         # one (1, D) row in HBM
            out_ref.at[pl.ds(t, 1), :],             # its slot in the VMEM block
            copy_sem,
        ).start()
        return carry

    lax.fori_loop(0, tb, issue, 0, unroll=8)

    # One block-sized wait retires tb * D * itemsize bytes -- exactly the sum
    # of the tb per-row copies signalled on the shared semaphore.  The dummy
    # descriptor is wait-only (never .start()ed); only its byte count matters,
    # and it is sourced from out_ref so it is valid even when V < tb.
    pltpu.make_async_copy(out_ref, out_ref, copy_sem).wait()


# ----------------------------------------------------------------------------
# Wrapper
# ----------------------------------------------------------------------------

def _pick_block_tokens(n_tokens, d, itemsize, requested, table_resident_bytes):
    """Largest multiple-of-8 token block that fits the VMEM budget (double-
    buffered output block + any VMEM-resident table) and leaves >= 2 grid
    steps when possible (so the parallel grid axis can use both v7x cores)."""
    tb = min(requested, _round_up(n_tokens, 8))
    budget = max(0, _VMEM_BUDGET_BYTES - table_resident_bytes)
    per_token = 2 * d * itemsize                    # double-buffered out block
    tb = min(tb, max(8, budget // per_token))
    tb = max(8, (tb // 8) * 8)
    while tb > 8 and _cdiv(n_tokens, tb) < 2:
        tb = max(8, (tb // 2 // 8) * 8)
    return tb


def _embed_one_chunk(ids_flat, table, *, block_tokens, use_fast_path):
    T = ids_flat.shape[0]
    V, D = table.shape
    itemsize = jnp.dtype(table.dtype).itemsize
    table_bytes = V * D * itemsize

    tb = _pick_block_tokens(T, D, itemsize, block_tokens,
                            table_bytes if use_fast_path else 0)
    t_pad = _round_up(T, tb)
    if t_pad != T:
        # Pad ids with 0 (a valid row); the pad rows are sliced off below.
        ids_flat = jnp.pad(ids_flat, (0, t_pad - T))

    grid = (t_pad // tb,)
    out_spec = pl.BlockSpec((tb, D), lambda i, ids: (i, 0))
    common = dict(
        out_shape=jax.ShapeDtypeStruct((t_pad, D), table.dtype),
        compiler_params=pltpu.CompilerParams(
            dimension_semantics=("parallel",),      # shard token blocks across TCs
            vmem_limit_bytes=_VMEM_LIMIT_BYTES,
        ),
        cost_estimate=pl.CostEstimate(
            flops=0,
            transcendentals=0,
            bytes_accessed=2 * t_pad * D * itemsize + t_pad * 4,
        ),
    )

    if use_fast_path:
        out = pl.pallas_call(
            _embed_vmem_kernel,
            grid_spec=pltpu.PrefetchScalarGridSpec(
                num_scalar_prefetch=1,              # ids -> SMEM
                grid=grid,
                in_specs=[pl.BlockSpec((V, D), lambda i, ids: (0, 0))],
                out_specs=out_spec,
            ),
            **common,
        )(ids_flat, table)
    else:
        out = pl.pallas_call(
            _embed_dma_kernel,
            grid_spec=pltpu.PrefetchScalarGridSpec(
                num_scalar_prefetch=1,              # ids -> SMEM
                grid=grid,
                in_specs=[pl.BlockSpec(memory_space=pl.ANY)],   # table stays in HBM
                out_specs=out_spec,
                scratch_shapes=[pltpu.SemaphoreType.DMA],
            ),
            **common,
        )(ids_flat, table)

    return out[:T]


def embeddings_forward(ids, table, *, block_tokens: int = 512,
                       fast_path_table_bytes: int = _FAST_PATH_TABLE_BYTES,
                       force_hbm_path: bool = False):
    """Pallas equivalent of Embeddings.forward: return lut(x).

    ids:   (B, S) integer tokens
    table: (V, D) embedding matrix (any dtype; the gather is a byte copy)
    returns (B, S, D) in table.dtype
    """
    B, S = ids.shape
    V, D = table.shape
    T = B * S

    ids_flat = ids.reshape(-1).astype(jnp.int32)
    # Define behavior for OOB / negative ids once in the wrapper.
    ids_flat = jnp.clip(ids_flat, 0, V - 1)

    itemsize = jnp.dtype(table.dtype).itemsize
    use_fast = (not force_hbm_path) and (V * D * itemsize <= fast_path_table_bytes)

    if T <= _MAX_TOKENS_PER_CALL:
        out = _embed_one_chunk(ids_flat, table,
                               block_tokens=block_tokens, use_fast_path=use_fast)
    else:
        # Chunk very long sequences so the scalar-prefetched ids stay within
        # the SMEM budget (SMEM pads 1-D arrays to next_pow2(4*N) bytes).
        chunks = []
        for start in range(0, T, _MAX_TOKENS_PER_CALL):
            chunks.append(_embed_one_chunk(
                ids_flat[start:start + _MAX_TOKENS_PER_CALL], table,
                block_tokens=block_tokens, use_fast_path=use_fast))
        out = jnp.concatenate(chunks, axis=0)

    return out.reshape(B, S, D)


# ----------------------------------------------------------------------------
# Demo / self-check
# ----------------------------------------------------------------------------

if __name__ == "__main__":
    vocab_size = 32
    d_model = 32
    batch, seq = 2, 8

    key = jax.random.PRNGKey(0)
    k_tab, k_ids, k_ids2 = jax.random.split(key, 3)

    # nn.Embedding default init: weight ~ N(0, 1), shape (vocab_size, d_model).
    table = jax.random.normal(k_tab, (vocab_size, d_model), dtype=jnp.float32)
    x = jax.random.randint(k_ids, (batch, seq), 0, vocab_size, dtype=jnp.int32)

    ref = jnp.take(table, x, axis=0)

    # 1) VMEM fast path (small table).
    out_fast = jax.block_until_ready(embeddings_forward(x, table))
    assert out_fast.shape == (batch, seq, d_model)
    assert jnp.array_equal(out_fast, ref), "fast-path mismatch vs reference"

    # 2) HBM DMA-gather path (large-table code path, forced here on small data).
    out_dma = jax.block_until_ready(embeddings_forward(x, table, force_hbm_path=True))
    assert jnp.array_equal(out_dma, ref), "DMA-path mismatch vs reference"

    # 3) Token count not a multiple of the block (exercises id padding / slice).
    x2 = jax.random.randint(k_ids2, (1, 5), 0, vocab_size, dtype=jnp.int32)
    out_odd = jax.block_until_ready(embeddings_forward(x2, table))
    assert jnp.array_equal(out_odd, jnp.take(table, x2, axis=0)), "odd-T mismatch"

    print("KERNEL_OK")
</pallas_src>

<mosaic_0001>
module attributes {stable_mosaic.version = 11 : i64} {
  func.func @_embed_vmem_kernel(%arg0: i32, %arg1: memref<16xi32, #tpu.memory_space<smem>>, %arg2: memref<32x32xf32, #tpu.memory_space<vmem>>, %arg3: memref<8x32xf32, #tpu.memory_space<vmem>>) attributes {dimension_semantics = [#tpu.dimension_semantics<parallel>], iteration_bounds = array<i64: 2>, scalar_prefetch = 1 : i64, scratch_operands = 0 : i64, tpu.core_type = #tpu.core_type<tc>, window_params = [{pipeline_mode = #tpu.pipeline_mode<synchronous>, transform_indices = @transform_0, window_bounds = array<i64: 32, 32>}, {transform_indices = @transform_1, window_bounds = array<i64: 8, 32>}]} {
    %c8_i32 = arith.constant 8 : i32
    %0 = arith.muli %arg0, %c8_i32 : i32
    %c0_i32 = arith.constant 0 : i32
    %1 = arith.addi %0, %c0_i32 : i32
    %2 = arith.index_cast %1 : i32 to index
    %3 = memref.load %arg1[%2] : memref<16xi32, #tpu.memory_space<smem>>
    %4 = arith.index_cast %3 : i32 to index
    %c0 = arith.constant 0 : index
    %5 = vector.load %arg2[%4, %c0] : memref<32x32xf32, #tpu.memory_space<vmem>>, vector<1x32xf32>
    %6 = arith.index_cast %c0_i32 : i32 to index
    %c0_0 = arith.constant 0 : index
    %7 = vector.load %arg3[%6, %c0_0] : memref<8x32xf32, #tpu.memory_space<vmem>>, vector<1x32xf32>
    tpu.vector_store %arg3[%6, %c0_0], %5 {strides = array<i32>} : memref<8x32xf32, #tpu.memory_space<vmem>>, vector<1x32xf32>,
    %c1_i32 = arith.constant 1 : i32
    %8 = arith.addi %0, %c1_i32 : i32
    %9 = arith.index_cast %8 : i32 to index
    %10 = memref.load %arg1[%9] : memref<16xi32, #tpu.memory_space<smem>>
    %11 = arith.index_cast %10 : i32 to index
    %c0_1 = arith.constant 0 : index
    %12 = vector.load %arg2[%11, %c0_1] : memref<32x32xf32, #tpu.memory_space<vmem>>, vector<1x32xf32>
    %13 = arith.index_cast %c1_i32 : i32 to index
    %c0_2 = arith.constant 0 : index
    %14 = vector.load %arg3[%13, %c0_2] : memref<8x32xf32, #tpu.memory_space<vmem>>, vector<1x32xf32>
    tpu.vector_store %arg3[%13, %c0_2], %12 {strides = array<i32>} : memref<8x32xf32, #tpu.memory_space<vmem>>, vector<1x32xf32>,
    %c2_i32 = arith.constant 2 : i32
    %15 = arith.addi %0, %c2_i32 : i32
    %16 = arith.index_cast %15 : i32 to index
    %17 = memref.load %arg1[%16] : memref<16xi32, #tpu.memory_space<smem>>
    %18 = arith.index_cast %17 : i32 to index
    %c0_3 = arith.constant 0 : index
    %19 = vector.load %arg2[%18, %c0_3] : memref<32x32xf32, #tpu.memory_space<vmem>>, vector<1x32xf32>
    %20 = arith.index_cast %c2_i32 : i32 to index
    %c0_4 = arith.constant 0 : index
    %21 = vector.load %arg3[%20, %c0_4] : memref<8x32xf32, #tpu.memory_space<vmem>>, vector<1x32xf32>
    tpu.vector_store %arg3[%20, %c0_4], %19 {strides = array<i32>} : memref<8x32xf32, #tpu.memory_space<vmem>>, vector<1x32xf32>,
    %c3_i32 = arith.constant 3 : i32
    %22 = arith.addi %0, %c3_i32 : i32
    %23 = arith.index_cast %22 : i32 to index
    %24 = memref.load %arg1[%23] : memref<16xi32, #tpu.memory_space<smem>>
    %25 = arith.index_cast %24 : i32 to index
    %c0_5 = arith.constant 0 : index
    %26 = vector.load %arg2[%25, %c0_5] : memref<32x32xf32, #tpu.memory_space<vmem>>, vector<1x32xf32>
    %27 = arith.index_cast %c3_i32 : i32 to index
    %c0_6 = arith.constant 0 : index
    %28 = vector.load %arg3[%27, %c0_6] : memref<8x32xf32, #tpu.memory_space<vmem>>, vector<1x32xf32>
    tpu.vector_store %arg3[%27, %c0_6], %26 {strides = array<i32>} : memref<8x32xf32, #tpu.memory_space<vmem>>, vector<1x32xf32>,
    %c4_i32 = arith.constant 4 : i32
    %29 = arith.addi %0, %c4_i32 : i32
    %30 = arith.index_cast %29 : i32 to index
    %31 = memref.load %arg1[%30] : memref<16xi32, #tpu.memory_space<smem>>
    %32 = arith.index_cast %31 : i32 to index
    %c0_7 = arith.constant 0 : index
    %33 = vector.load %arg2[%32, %c0_7] : memref<32x32xf32, #tpu.memory_space<vmem>>, vector<1x32xf32>
    %34 = arith.index_cast %c4_i32 : i32 to index
    %c0_8 = arith.constant 0 : index
    %35 = vector.load %arg3[%34, %c0_8] : memref<8x32xf32, #tpu.memory_space<vmem>>, vector<1x32xf32>
    tpu.vector_store %arg3[%34, %c0_8], %33 {strides = array<i32>} : memref<8x32xf32, #tpu.memory_space<vmem>>, vector<1x32xf32>,
    %c5_i32 = arith.constant 5 : i32
    %36 = arith.addi %0, %c5_i32 : i32
    %37 = arith.index_cast %36 : i32 to index
    %38 = memref.load %arg1[%37] : memref<16xi32, #tpu.memory_space<smem>>
    %39 = arith.index_cast %38 : i32 to index
    %c0_9 = arith.constant 0 : index
    %40 = vector.load %arg2[%39, %c0_9] : memref<32x32xf32, #tpu.memory_space<vmem>>, vector<1x32xf32>
    %41 = arith.index_cast %c5_i32 : i32 to index
    %c0_10 = arith.constant 0 : index
    %42 = vector.load %arg3[%41, %c0_10] : memref<8x32xf32, #tpu.memory_space<vmem>>, vector<1x32xf32>
    tpu.vector_store %arg3[%41, %c0_10], %40 {strides = array<i32>} : memref<8x32xf32, #tpu.memory_space<vmem>>, vector<1x32xf32>,
    %c6_i32 = arith.constant 6 : i32
    %43 = arith.addi %0, %c6_i32 : i32
    %44 = arith.index_cast %43 : i32 to index
    %45 = memref.load %arg1[%44] : memref<16xi32, #tpu.memory_space<smem>>
    %46 = arith.index_cast %45 : i32 to index
    %c0_11 = arith.constant 0 : index
    %47 = vector.load %arg2[%46, %c0_11] : memref<32x32xf32, #tpu.memory_space<vmem>>, vector<1x32xf32>
    %48 = arith.index_cast %c6_i32 : i32 to index
    %c0_12 = arith.constant 0 : index
    %49 = vector.load %arg3[%48, %c0_12] : memref<8x32xf32, #tpu.memory_space<vmem>>, vector<1x32xf32>
    tpu.vector_store %arg3[%48, %c0_12], %47 {strides = array<i32>} : memref<8x32xf32, #tpu.memory_space<vmem>>, vector<1x32xf32>,
    %c7_i32 = arith.constant 7 : i32
    %50 = arith.addi %0, %c7_i32 : i32
    %51 = arith.index_cast %50 : i32 to index
    %52 = memref.load %arg1[%51] : memref<16xi32, #tpu.memory_space<smem>>
    %53 = arith.index_cast %52 : i32 to index
    %c0_13 = arith.constant 0 : index
    %54 = vector.load %arg2[%53, %c0_13] : memref<32x32xf32, #tpu.memory_space<vmem>>, vector<1x32xf32>
    %55 = arith.index_cast %c7_i32 : i32 to index
    %c0_14 = arith.constant 0 : index
    %56 = vector.load %arg3[%55, %c0_14] : memref<8x32xf32, #tpu.memory_space<vmem>>, vector<1x32xf32>
    tpu.vector_store %arg3[%55, %c0_14], %54 {strides = array<i32>} : memref<8x32xf32, #tpu.memory_space<vmem>>, vector<1x32xf32>,
    %c8_i32_15 = arith.constant 8 : i32
    return
  }
  func.func @transform_0(%arg0: i32, %arg1: memref<16xi32, #tpu.memory_space<smem>>) -> (i32, i32) {
    %c0_i32 = arith.constant 0 : i32
    %c0_i32_0 = arith.constant 0 : i32
    %c0_i32_1 = arith.constant 0 : i32
    return %c0_i32, %c0_i32_0 : i32, i32
  }
  func.func @transform_1(%arg0: i32, %arg1: memref<16xi32, #tpu.memory_space<smem>>) -> (i32, i32) {
    %c0_i32 = arith.constant 0 : i32
    %c0_i32_0 = arith.constant 0 : i32
    return %arg0, %c0_i32 : i32, i32
  }
}

</mosaic_0001>

<bundles_post_ra>
// kernel: tpu_custom_call.1
= control target key start
LH: loop header
LB: loop body
LE: loop exit
PB: predicated region body
PF: predicated region fallthrough
CT: control target
= control target key end

     0   :  { %s421_s12 = smov [#allocation3]   ;;  %s567_s0 = inlined_call_operand.hbm [shape: s32[16], index: 0, kind: input, shape index: {}]   ;;  %s568_s1 = inlined_call_operand.hbm [shape: f32[32,32], index: 1, kind: input, shape index: {}]   ;;  %s569_s2 = inlined_call_operand.hbm [shape: f32[16,32], index: 2, kind: output, shape index: {}]  }
   0x1   :  { %s8_s11 = sshll.u32 %s567_s0, 4  ;;  %s9_s11 = int_to_ptr.hbm [resolvable:$true] %s8_s11 }
   0x2   :  { %11 = dma.hbm_to_smem %s9_s11, 16, %s421_s12, [#allocation2] }
   0x3   :  { %395 = dma.done.wait [#allocation2], 16 }
   0x4   :  { %396 = vsyncadd [#allocation2], 4294967280 }
   0x5   :  { %14 = sfence }
   0x6   :  { %15 = vsyncpa [#allocation5], 0 }
   0x7   :  { %16 = vsyncpa [#allocation6], 0 }
   0x8   :  { %18 = vsyncpa [#allocation6 + $0x1], 0  ;;  %s443_s13 = smov 0   ;;  %s445_s14 = smov 0  }
   0x9   :  { %s447_s15 = smov 0   ;;  %s449_s16 = smov 0  }
   0xa LB: > { %s464_s0 = sadd.s32 4294967295, %s419_s16   ;;  %s245_s17 = sadd.s32 4294967294, %s419_s16   ;;  %s419_s16 = sphi %s449_s16, %s575_s16   ;;  %s415_s15 = sphi %s447_s15, %s574_s15   ;;  %s411_s14 = sphi %s445_s14, %s573_s14   ;;  %s407_s13 = sphi %s443_s13, %s572_s13  }
   0xb   : > { %s468_s18 = sadd.s32 1, %s419_s16   ;;  %s52_s19 = sadd.s32 1, %s415_s15 }
   0xc   : > { %s49_s20 = ssub.s32 %s419_s16, %s468_s18  ;;  %p62_p0 = scmp.ne.s32.totalorder %s415_s15, %s411_s14 }
   0xd   : > { %p50_p1 = scmp.eq.s32.totalorder %s49_s20, 0  ;;  %p63_p2 = scmp.eq.s32.totalorder %s464_s0, 1 }
   0xe   : > { %p68_p3 = scmp.ne.s32.totalorder %s411_s14, %s407_s13  ;;  %p69_p4 = scmp.eq.s32.totalorder %s245_s17, 1 }
   0xf   : > { %s479_s21 = scalar_select %p50_p1, %s415_s15, %s52_s19  }
  0x10   : > { %p481_p5 = por %p63_p2, %p62_p0  ;;  %p485_p6 = por %p69_p4, %p68_p3 }
  0x11   : > { %p246_p7 = scmp.ge.s32.totalorder %s419_s16, 1  ;;  %p76_p8 = scmp.lt.s32.totalorder %s419_s16, 3 }
  0x12   : > { %p270_p9 = scmp.eq.s32.totalorder %s464_s0, 0  ;;  %s87_s26 = sshll.u32 %s568_s1, 4  ;;  %s88_s26 = int_to_ptr.hbm [resolvable:$true] %s87_s26 }
  0x13   : > { %p77_p10 = pnand %p246_p7, %p76_p8  ;;  %s422_s27 = smov [#allocation4]  }
  0x14   : > { %s89_s28 = sshll.u32 %s422_s27, 4  ;;  %s423_s29 = smov 128   ;;  %s90_s28 = int_to_ptr.vmem [resolvable:$true] %s89_s28 }
  0x15   : > { %p262_p11 = pneg %p77_p10  ;;  %s424_s30 = smov 8  }
  0x16   : > { %105 = sbr.rel (%p77_p10) target bundleno = 55 (0x37), region = 24 }
  0x17   : > { %p263_p12 = pnand %p270_p9, %p262_p11 }
  0x19   : > { %265 = dma.hbm_to_vmem [thread:$0]  (!%p263_p12), %s88_s26, 512, %s90_s28, [#allocation5], %s423_s29, %s423_s29, %s424_s30  }
  0x1b   : > { %398 = dma.done.wait (%p270_p9), [#allocation5], 512  }
  0x1c   : > { %400 = vsyncadd (%p270_p9), [#allocation5], 4294966784  ;;  %s118_s3 = sand.u32 1, %s411_s14   ;;  %s503_s4 = sshll.u32 %s464_s0, 3  ;;  %vm125_vm0 = vcmask 253952  }
  0x1d   : > { %s250_s5 = sshll.u32 %s118_s3, 3  ;;  %s122_s6 = sld [smem:[#allocation3 + %s503_s4]] }
  0x1e   : > { %s127_s7 = sadd.s32 1, %s503_s4  ;;  %s132_s8 = sadd.s32 2, %s503_s4 }
  0x1f   : > { %s128_s9 = sld [smem:[#allocation3 + %s127_s7]]  ;;  %s137_s10 = sadd.s32 3, %s503_s4 }
  0x20   : > { %s133_s11 = sld [smem:[#allocation3 + %s132_s8]]  ;;  %s142_s12 = sadd.s32 4, %s503_s4 }
  0x21   : > { %s138_s0 = sld [smem:[#allocation3 + %s137_s10]]  ;;  %s147_s17 = sadd.s32 5, %s503_s4 }
  0x22   : > { %s143_s19 = sld [smem:[#allocation3 + %s142_s12]]  ;;  %s152_s25 = sadd.s32 6, %s503_s4 }
  0x23   : > { %s123_s20 = scalar_lea.vmem [#allocation4], %s122_s6  ;;  %s148_s24 = sld [smem:[#allocation3 + %s147_s17]] }
  0x24   : > { %v124_v0 = vld [vmem:[%s123_s20] sm:$0x1]  ;;  %s514_s26 = scalar_lea.vmem [#allocation7], %s250_s5  ;;  %s153_s27 = sld [smem:[#allocation3 + %s152_s25]] }
  0x25   : > { %126 = vst.msk [vmem:[%s514_s26] sm:$0x1] %vm125_vm0, %v124_v0  ;;  %s157_s28 = sadd.s32 7, %s503_s4  ;;  %s129_s30 = scalar_lea.vmem [#allocation4], %s128_s9 }
  0x26   : > { %s158_s29 = sld [smem:[#allocation3 + %s157_s28]]  ;;  %v130_v1 = vld [vmem:[%s129_s30] sm:$0x1]  ;;  %s173_s8 = scalar_lea.hbm %s569_s2, %s503_s4 }
  0x27   : > { %131 = vst.msk [vmem:[%s514_s26 + $0x1] sm:$0x1] %vm125_vm0, %v130_v1  ;;  %s134_s5 = scalar_lea.vmem [#allocation4], %s133_s11  ;;  %s175_s10 = sshll.u32 %s514_s26, 4  ;;  %s176_s10 = int_to_ptr.vmem [resolvable:$true] %s175_s10 }
  0x28   : > { %v135_v2 = vld [vmem:[%s134_s5] sm:$0x1]  ;;  %s139_s12 = scalar_lea.vmem [#allocation4], %s138_s0  ;;  %s144_s9 = scalar_lea.vmem [#allocation4], %s143_s19 }
  0x29   : > { %136 = vst.msk [vmem:[%s514_s26 + $0x2] sm:$0x1] %vm125_vm0, %v135_v2  ;;  %v140_v3 = vld [vmem:[%s139_s12] sm:$0x1]  ;;  %s177_s17 = sshll.u32 %s173_s8, 4  ;;  %s149_s4 = scalar_lea.vmem [#allocation4], %s148_s24  ;;  %s178_s17 = int_to_ptr.hbm [resolvable:$true] %s177_s17 }
  0x2a   : > { %141 = vst.msk [vmem:[%s514_s26 + $0x3] sm:$0x1] %vm125_vm0, %v140_v3  ;;  %v145_v4 = vld [vmem:[%s144_s9] sm:$0x1]  ;;  %s154_s11 = scalar_lea.vmem [#allocation4], %s153_s27  ;;  %s163_s19 = scalar_lea.sflag [#allocation6], %s118_s3 }
  0x2b   : > { %146 = vst.msk [vmem:[%s514_s26 + $0x4] sm:$0x1] %vm125_vm0, %v145_v4  ;;  %v150_v5 = vld [vmem:[%s149_s4] sm:$0x1]  ;;  %s365_s20 = sshra.s32 %s178_s17, 4  ;;  %s371_s27 = scalar_lea.hbm %s569_s2, 16  ;;  %s366_s20 = int_to_ptr.hbm [resolvable:$true] %s365_s20 }
  0x2c   : > { %151 = vst.msk [vmem:[%s514_s26 + $0x5] sm:$0x1] %vm125_vm0, %v150_v5  ;;  %v155_v6 = vld [vmem:[%s154_s11] sm:$0x1]  ;;  %s159_s0 = scalar_lea.vmem [#allocation4], %s158_s29  ;;  %s367_s25 = scalar_lea.hbm %s366_s20, 8 }
  0x2d   : > { %156 = vst.msk [vmem:[%s514_s26 + $0x6] sm:$0x1] %vm125_vm0, %v155_v6  ;;  %v160_v7 = vld [vmem:[%s159_s0] sm:$0x1]  ;;  %p368_p13 = scmp.ne.s32.totalorder %s366_s20, %s367_s25  ;;  %p372_p2 = scmp.lt.s32.totalorder %s366_s20, %s569_s2 }
  0x2e   : > { %161 = vst.msk [vmem:[%s514_s26 + $0x7] sm:$0x1] %vm125_vm0, %v160_v7  ;;  %p373_p3 = scmp.lt.s32.totalorder %s371_s27, %s367_s25 }
  0x2f   : > { %p369_p0 = pnand %p368_p13, %p481_p5 }
  0x30   : > { %p374_p4 = por %p373_p3, %p372_p2 }
  0x31   : > { %p370_p1 = pneg %p369_p0 }
  0x33   : > { %p375_p7 = pnand %p374_p4, %p370_p1 }
  0x35   : > { %378 = shalt.err (!%p375_p7)
}
  0x36   : > { %260 = dma.vmem_to_hbm [thread:$0]  (%p481_p5), %s176_s10, 128, %s178_s17, %s163_s19  }
  0x37 PF: > { %p272_p8 = scmp.ge.s32.totalorder %s419_s16, 2  ;;  %s189_s3 = sand.u32 1, %s407_s13  }
  0x38   : > { %s190_s26 = scalar_lea.sflag [#allocation6], %s189_s3 }
  0x39   : > { %p267_p9 = pnand %p272_p8, %p485_p6 }
  0x3b   : > { %p268_p10 = pneg %p267_p9 }
  0x3d   : > { %402 = dma.done.wait (%p268_p10), %s190_s26, 128  }
  0x3e   : > { %404 = vsyncadd (%p268_p10), %s190_s26, 4294967168  ;;  %p21_p11 = scmp.ge.s32.totalorder %s468_s18, 4   ;;  %s572_s13 = smov %s411_s14 }
  0x3f   : > { %s573_s14 = smov %s415_s15  ;;  %s574_s15 = smov %s479_s21 }
  0x40   : > { %s575_s16 = smov %s468_s18  ;;  %23 = sbr.rel (!%p21_p11) target bundleno = 10 (0xa), region = 69 }
  0x45   :  { %196 = vsyncpa [#allocation5], 1 }
  0x46   :  { %198 = vsyncpa [#allocation5 + $0x1], 1 }
  0x47   :  { %199 = vsyncpa [#allocation6], 1 }
  0x48   :  { %201 = vsyncpa [#allocation6 + $0x1], 1 }

</bundles_post_ra>
